<compile_context>
chip_gen: v5e
topology: v5e:2x2
jax: 0.10.0
libtpu: 0.0.40
codegen_flags: <defaults>
</compile_context>

<pallas_src>
import jax
import jax.numpy as jnp
from jax.experimental import pallas as pl
from jax.experimental.pallas import tpu as pltpu

LANES = 128
SUBLANE_BF16 = 16          # bf16 packs 16 rows per vreg sublane group


def _round_up(n, m):
    return -(-n // m) * m


def _cdiv(a, b):
    return -(-a // b)


def actor_kernel(x_ref, w1_ref, b1_ref, wh_ref, bh_ref, out_ref):
    # Stage 1: (tb,256)bf16 @ (256,256)bf16 on the MXU, f32 accumulation.
    h = jnp.dot(x_ref[...], w1_ref[...], preferred_element_type=jnp.float32)
    h = jnp.maximum(h + b1_ref[...], 0.0)          # bias + ReLU in f32 (VPU)
    # Stage 2: fused fc2/fc3 heads -> single (tb,256)@(256,128) dot and one
    # lane-dense 128-wide unmasked store (no masked vst.msk).
    out_ref[...] = (jnp.dot(h.astype(jnp.bfloat16), wh_ref[...],
                            preferred_element_type=jnp.float32) + bh_ref[...])


def spectral_normalize(w, key, n_power_iterations=1, eps=1e-12):
    """Mimic torch.nn.utils.spectral_norm: W / sigma(W) via power iteration.

    w has PyTorch layout (out_features, in_features). One-time parameter
    preprocessing (glue), done outside the kernel.
    """
    out_f, _ = w.shape
    u = jax.random.normal(key, (out_f,), dtype=w.dtype)
    u = u / (jnp.linalg.norm(u) + eps)
    v = w.T @ u
    v = v / (jnp.linalg.norm(v) + eps)
    for _ in range(max(n_power_iterations - 1, 0)):
        u = w @ v
        u = u / (jnp.linalg.norm(u) + eps)
        v = w.T @ u
        v = v / (jnp.linalg.norm(v) + eps)
    u = w @ v
    u = u / (jnp.linalg.norm(u) + eps)
    sigma = u @ (w @ v)
    return w / sigma


def _make_linear(kw, kb, ku, in_f, out_f):
    """PyTorch-Linear-style init + spectral norm.

    Returns weight pre-transposed to (in, out) and bias (out,), both f32.
    """
    bound = 1.0 / float(in_f) ** 0.5
    w = jax.random.uniform(kw, (out_f, in_f), minval=-bound, maxval=bound,
                           dtype=jnp.float32)
    b = jax.random.uniform(kb, (out_f,), minval=-bound, maxval=bound,
                           dtype=jnp.float32)
    w = spectral_normalize(w, ku)
    return w.T, b


def prepare_params(w1, b1, w2, b2, w3, b3):
    """Fuse the two heads column-wise, pad to 128 lanes, cast weights to bf16."""
    head_w = jnp.concatenate([w2, w3], axis=1)        # (256, 50 + num_actions)
    head_b = jnp.concatenate([b2, b3], axis=0)
    n_head = head_w.shape[1]
    pad = (-n_head) % LANES                           # pad out-dim to 128 lanes
    head_w = jnp.pad(head_w, ((0, 0), (0, pad)))
    head_b = jnp.pad(head_b, ((0, pad),))
    return (w1.astype(jnp.bfloat16),
            b1.reshape(1, -1).astype(jnp.float32),
            head_w.astype(jnp.bfloat16),
            head_b.reshape(1, -1).astype(jnp.float32))


def fake_actor_net(x, params, num_actions):
    """Returns (state, action_probs) matching FakeActorNet.forward.

    params = (w1_bf16 (256,256), b1_f32 (1,256),
              wh_bf16 (256,128 padded), bh_f32 (1,128 padded)).
    """
    w1, b1, wh, bh = params
    B, D = x.shape
    H1 = w1.shape[1]
    NH = wh.shape[1]

    # Stream x in bf16 (halves HBM traffic for the dominant input stream; the
    # MXU consumes bf16 anyway).
    x = x.astype(jnp.bfloat16)

    # Batch tiling (multiples of 16 for bf16 sublane packing):
    #  * small B: one sublane-aligned tile, single grid step.
    #  * large B: >=2 near-even steps (v7x megacore sharding via "parallel"),
    #    tiles up to 1024 rows to amortize the ~0.35 us per-grid-step cost.
    # Note: for tiny batches an XLA fallback would beat the custom-call launch
    # cost; kept on the Pallas path here so the kernel is always exercised.
    b16 = _round_up(B, SUBLANE_BF16)
    if b16 <= 512:
        tile_b = b16
        n_steps = 1
    else:
        n_steps = max(2, _cdiv(b16, 1024))
        tile_b = _round_up(_cdiv(b16, n_steps), SUBLANE_BF16)
    padded_b = tile_b * n_steps
    if padded_b != B:
        x = jnp.pad(x, ((0, padded_b - B), (0, 0)))
    grid = (n_steps,)

    itemsize = lambda a: a.size * a.dtype.itemsize
    cost = pl.CostEstimate(
        flops=2 * padded_b * D * (H1 + NH),
        transcendentals=0,
        bytes_accessed=(itemsize(x) + itemsize(w1) + itemsize(b1)
                        + itemsize(wh) + itemsize(bh) + padded_b * NH * 4),
    )

    out = pl.pallas_call(
        actor_kernel,
        out_shape=jax.ShapeDtypeStruct((padded_b, NH), jnp.float32),
        grid=grid,
        in_specs=[
            pl.BlockSpec((tile_b, D), lambda i: (i, 0)),   # x: tiled over batch
            pl.BlockSpec((D, H1), lambda i: (0, 0)),       # w1: pinned in VMEM
            pl.BlockSpec((1, H1), lambda i: (0, 0)),       # b1: pinned
            pl.BlockSpec((D, NH), lambda i: (0, 0)),       # fused head w: pinned
            pl.BlockSpec((1, NH), lambda i: (0, 0)),       # fused head b: pinned
        ],
        out_specs=pl.BlockSpec((tile_b, NH), lambda i: (i, 0)),
        compiler_params=pltpu.CompilerParams(
            dimension_semantics=("parallel",)),
        cost_estimate=cost,
    )(x, w1, b1, wh, bh)

    out = out[:B]
    state = out[:, :50]
    action_probs = out[:, 50:50 + num_actions]
    return state, action_probs


if __name__ == "__main__":
    key = jax.random.PRNGKey(0)
    keys = jax.random.split(key, 10)

    num_actions = 8
    B = 8          # small batch; kernel pads/tiles larger batches automatically
    D_IN = 256

    w1, b1 = _make_linear(keys[0], keys[1], keys[2], D_IN, 256)
    w2, b2 = _make_linear(keys[3], keys[4], keys[5], D_IN, 50)
    w3, b3 = _make_linear(keys[6], keys[7], keys[8], D_IN, num_actions)

    x = jax.random.normal(keys[9], (B, D_IN), dtype=jnp.float32)

    params = prepare_params(w1, b1, w2, b2, w3, b3)
    state, action_probs = fake_actor_net(x, params, num_actions)
    jax.block_until_ready((state, action_probs))

    # Pure-JAX reference using the SAME bf16-quantized weights / x / h with
    # f32 accumulation (matches the kernel's math; bf16 quantization needs a
    # looser tolerance than pure f32 would).
    w1f = params[0].astype(jnp.float32)
    b1f = params[1]
    whf = params[2].astype(jnp.float32)
    bhf = params[3]
    xb = x.astype(jnp.bfloat16).astype(jnp.float32)
    h_ref = jnp.maximum(xb @ w1f + b1f, 0.0)
    out_ref = h_ref.astype(jnp.bfloat16).astype(jnp.float32) @ whf + bhf
    ref_state = out_ref[:, :50]
    ref_act = out_ref[:, 50:50 + num_actions]

    assert state.shape == (B, 50) and action_probs.shape == (B, num_actions)
    assert jnp.allclose(state, ref_state, atol=2e-3, rtol=2e-3)
    assert jnp.allclose(action_probs, ref_act, atol=2e-3, rtol=2e-3)

    print("KERNEL_OK")
</pallas_src>

<mosaic_0001>
module attributes {stable_mosaic.version = 11 : i64} {
  func.func @actor_kernel(%arg0: i32, %arg1: memref<16x256xbf16, #tpu.memory_space<vmem>>, %arg2: memref<256x256xbf16, #tpu.memory_space<vmem>>, %arg3: memref<1x256xf32, #tpu.memory_space<vmem>>, %arg4: memref<256x128xbf16, #tpu.memory_space<vmem>>, %arg5: memref<1x128xf32, #tpu.memory_space<vmem>>, %arg6: memref<16x128xf32, #tpu.memory_space<vmem>>) attributes {dimension_semantics = [#tpu.dimension_semantics<parallel>], iteration_bounds = array<i64: 1>, scalar_prefetch = 0 : i64, scratch_operands = 0 : i64, tpu.core_type = #tpu.core_type<tc>, window_params = [{transform_indices = @transform_0, window_bounds = array<i64: 16, 256>}, {pipeline_mode = #tpu.pipeline_mode<synchronous>, transform_indices = @transform_1, window_bounds = array<i64: 256, 256>}, {pipeline_mode = #tpu.pipeline_mode<synchronous>, transform_indices = @transform_2, window_bounds = array<i64: 1, 256>}, {pipeline_mode = #tpu.pipeline_mode<synchronous>, transform_indices = @transform_3, window_bounds = array<i64: 256, 128>}, {pipeline_mode = #tpu.pipeline_mode<synchronous>, transform_indices = @transform_4, window_bounds = array<i64: 1, 128>}, {transform_indices = @transform_5, window_bounds = array<i64: 16, 128>}]} {
    %c0 = arith.constant 0 : index
    %c0_0 = arith.constant 0 : index
    %0 = vector.load %arg1[%c0, %c0_0] : memref<16x256xbf16, #tpu.memory_space<vmem>>, vector<16x256xbf16>
    %c0_1 = arith.constant 0 : index
    %c0_2 = arith.constant 0 : index
    %1 = vector.load %arg2[%c0_1, %c0_2] : memref<256x256xbf16, #tpu.memory_space<vmem>>, vector<256x256xbf16>
    %cst = arith.constant dense<0.000000e+00> : vector<16x256xf32>
    %2 = tpu.matmul %0, %1, %cst {dimension_numbers = #tpu.dot_dimension_numbers<[1], [0], [0], [1], [0, 0, 1, 1], [], []>} : vector<16x256xbf16>, vector<256x256xbf16>, vector<16x256xf32> -> vector<16x256xf32>
    %c0_3 = arith.constant 0 : index
    %c0_4 = arith.constant 0 : index
    %3 = vector.load %arg3[%c0_3, %c0_4] : memref<1x256xf32, #tpu.memory_space<vmem>>, vector<1x256xf32>
    %4 = vector.broadcast %3 : vector<1x256xf32> to vector<16x256xf32>
    %5 = arith.addf %2, %4 : vector<16x256xf32>
    %cst_5 = arith.constant 0.000000e+00 : f32
    %6 = vector.broadcast %cst_5 : f32 to vector<16x256xf32>
    %7 = arith.maximumf %5, %6 : vector<16x256xf32>
    %8 = arith.truncf %7 : vector<16x256xf32> to vector<16x256xbf16>
    %c0_6 = arith.constant 0 : index
    %c0_7 = arith.constant 0 : index
    %9 = vector.load %arg4[%c0_6, %c0_7] : memref<256x128xbf16, #tpu.memory_space<vmem>>, vector<256x128xbf16>
    %cst_8 = arith.constant dense<0.000000e+00> : vector<16x128xf32>
    %10 = tpu.matmul %8, %9, %cst_8 {dimension_numbers = #tpu.dot_dimension_numbers<[1], [0], [0], [1], [0, 0, 1, 1], [], []>} : vector<16x256xbf16>, vector<256x128xbf16>, vector<16x128xf32> -> vector<16x128xf32>
    %c0_9 = arith.constant 0 : index
    %c0_10 = arith.constant 0 : index
    %11 = vector.load %arg5[%c0_9, %c0_10] : memref<1x128xf32, #tpu.memory_space<vmem>>, vector<1x128xf32>
    %12 = vector.broadcast %11 : vector<1x128xf32> to vector<16x128xf32>
    %13 = arith.addf %10, %12 : vector<16x128xf32>
    %c0_11 = arith.constant 0 : index
    %c0_12 = arith.constant 0 : index
    %14 = vector.load %arg6[%c0_11, %c0_12] : memref<16x128xf32, #tpu.memory_space<vmem>>, vector<16x128xf32>
    tpu.vector_store %arg6[%c0_11, %c0_12], %13 {strides = array<i32>} : memref<16x128xf32, #tpu.memory_space<vmem>>, vector<16x128xf32>,
    return
  }
  func.func @transform_0(%arg0: i32) -> (i32, i32) {
    %c0_i32 = arith.constant 0 : i32
    %c0_i32_0 = arith.constant 0 : i32
    return %arg0, %c0_i32 : i32, i32
  }
  func.func @transform_1(%arg0: i32) -> (i32, i32) {
    %c0_i32 = arith.constant 0 : i32
    %c0_i32_0 = arith.constant 0 : i32
    %c0_i32_1 = arith.constant 0 : i32
    return %c0_i32, %c0_i32_0 : i32, i32
  }
  func.func @transform_2(%arg0: i32) -> (i32, i32) {
    %c0_i32 = arith.constant 0 : i32
    %c0_i32_0 = arith.constant 0 : i32
    %c0_i32_1 = arith.constant 0 : i32
    return %c0_i32, %c0_i32_0 : i32, i32
  }
  func.func @transform_3(%arg0: i32) -> (i32, i32) {
    %c0_i32 = arith.constant 0 : i32
    %c0_i32_0 = arith.constant 0 : i32
    %c0_i32_1 = arith.constant 0 : i32
    return %c0_i32, %c0_i32_0 : i32, i32
  }
  func.func @transform_4(%arg0: i32) -> (i32, i32) {
    %c0_i32 = arith.constant 0 : i32
    %c0_i32_0 = arith.constant 0 : i32
    %c0_i32_1 = arith.constant 0 : i32
    return %c0_i32, %c0_i32_0 : i32, i32
  }
  func.func @transform_5(%arg0: i32) -> (i32, i32) {
    %c0_i32 = arith.constant 0 : i32
    %c0_i32_0 = arith.constant 0 : i32
    return %arg0, %c0_i32 : i32, i32
  }
}

</mosaic_0001>

<bundles_post_ra>
// kernel: tpu_custom_call.1
= control target key start
LH: loop header
LB: loop body
LE: loop exit
PB: predicated region body
PF: predicated region fallthrough
CT: control target
= control target key end

     0   :  { %10 = vsyncpa [#allocation3], 0  ;;  %s991_s0 = inlined_call_operand.hbm [shape: bf16[16,256], index: 0, kind: input, shape index: {}]   ;;  %s992_s1 = inlined_call_operand.hbm [shape: bf16[256,256], index: 1, kind: input, shape index: {}]   ;;  %s993_s2 = inlined_call_operand.hbm [shape: f32[1,256], index: 2, kind: input, shape index: {}]   ;;  %s994_s3 = inlined_call_operand.hbm [shape: bf16[256,128], index: 3, kind: input, shape index: {}]   ;;  %s995_s4 = inlined_call_operand.vmem [shape: f32[1,128], index: 4, kind: input, shape index: {}]   ;;  %s996_s5 = inlined_call_operand.hbm [shape: f32[16,128], index: 5, kind: output, shape index: {}]  }
   0x1   :  { %11 = vsyncpa [#allocation6], 0 }
   0x2   :  { %12 = vsyncpa [#allocation9], 0 }
   0x3   :  { %13 = vsyncpa [#allocation4], 0  ;;  %s31_s20 = sshll.u32 %s992_s1, 4  ;;  %s925_s21 = smov [#allocation5]   ;;  %s32_s20 = int_to_ptr.hbm [resolvable:$true] %s31_s20 }
   0x4   :  { %s33_s22 = sshll.u32 %s925_s21, 4  ;;  %s18_s25 = sshll.u32 %s991_s0, 4  ;;  %s34_s22 = int_to_ptr.vmem [resolvable:$true] %s33_s22  ;;  %s19_s25 = int_to_ptr.hbm [resolvable:$true] %s18_s25 }
   0x5   :  { %s926_s26 = smov 128   ;;  %s927_s27 = smov 8  }
   0x6   :  { %39 = dma.hbm_to_vmem [thread:$0]  %s32_s20, 4096, %s34_s22, [#allocation6], %s926_s26, %s926_s26, %s927_s27  }
   0x7   :  { %s928_s28 = smov [#allocation2]   ;;  %s45_s1 = sshll.u32 %s993_s2, 4  ;;  %s46_s1 = int_to_ptr.hbm [resolvable:$true] %s45_s1 }
   0x8   :  { %s20_s29 = sshll.u32 %s928_s28, 4  ;;  %s55_s8 = sshll.u32 %s994_s3, 4  ;;  %s21_s29 = int_to_ptr.vmem [resolvable:$true] %s20_s29  ;;  %s56_s8 = int_to_ptr.hbm [resolvable:$true] %s55_s8 }
   0x9   :  { %26 = dma.hbm_to_vmem [thread:$0]  %s19_s25, 256, %s21_s29, [#allocation3], %s926_s26, %s926_s26, %s927_s27  }
   0xa   :  { %s929_s9 = smov [#allocation7]   ;;  %s930_s11 = smov [#allocation8]  }
   0xb   :  { %s47_s10 = sshll.u32 %s929_s9, 4  ;;  %s57_s12 = sshll.u32 %s930_s11, 4  ;;  %s48_s10 = int_to_ptr.vmem [resolvable:$true] %s47_s10  ;;  %s58_s12 = int_to_ptr.vmem [resolvable:$true] %s57_s12 }
   0xc   :  { %50 = dma.hbm_to_vmem [thread:$0]  %s46_s1, 32, %s48_s10, [#allocation6]  }
   0xd   :  { %s931_s13 = smov 64   ;;  %s932_s2 = smov 4  }
   0xe   :  { %63 = dma.hbm_to_vmem [thread:$0]  %s56_s8, 2048, %s58_s12, [#allocation9], %s931_s13, %s931_s13, %s932_s2  }
   0xf   :  { %917 = dma.done.wait [#allocation3], 256  }
  0x10   :  { %918 = vsyncadd [#allocation3], 4294967040 }
  0x11   :  { %919 = dma.done.wait [#allocation6], 4128  }
  0x12   :  { %920 = vsyncadd [#allocation6], 4294963168 }
  0x13   :  { %921 = dma.done.wait [#allocation9], 2048  }
  0x14   :  { %922 = vsyncadd [#allocation9], 4294965248  ;;  %v603_v0 = vld [vmem:[#allocation5 + $0x70] sm:$0xf]  ;;  %v754_v1 = vld [vmem:[#allocation5 + $0x74] sm:$0xf0] }
  0x15   :  { %v667_v2 = vld [vmem:[#allocation5 + $0xf0] sm:$0xf]  ;;  %v604_v3 = vor.u32 %v754_v1, %v603_v0  ;;  %v770_v4 = vld [vmem:[#allocation5 + $0xf4] sm:$0xf0]  ;;  %v753_v5 = vld [vmem:[#allocation5 + $0x74] sm:$0xf] }
  0x16   :  { %v605_v6 = vld [vmem:[#allocation5 + $0x78] sm:$0xf0]  ;;  %v668_v7 = vor.u32 %v770_v4, %v667_v2  ;;  %v769_v9 = vld [vmem:[#allocation5 + $0xf4] sm:$0xf]  ;;  %v595_v11 = vld [vmem:[#allocation5 + $0x60] sm:$0xf] }
  0x17   :  { %v608_v8 = vor.u32 %v753_v5, %v605_v6  ;;  %v669_v10 = vld [vmem:[#allocation5 + $0xf8] sm:$0xf0]  ;;  %292 = vmatpush.bf16.msra.mxu0 %v604_v3  ;;  %v752_v13 = vld [vmem:[#allocation5 + $0x64] sm:$0xf0]  ;;  %v659_v14 = vld [vmem:[#allocation5 + $0xe0] sm:$0xf] }
  0x18   :  { %v672_v12 = vor.u32 %v769_v9, %v669_v10  ;;  %v768_v15 = vld [vmem:[#allocation5 + $0xe4] sm:$0xf0]  ;;  %306 = vmatpush.bf16.msra.mxu1 %v668_v7  ;;  %v596_v16 = vor.u32 %v752_v13, %v595_v11  ;;  %v751_v18 = vld [vmem:[#allocation5 + $0x64] sm:$0xf]  ;;  %v597_v19 = vld [vmem:[#allocation5 + $0x68] sm:$0xf0] }
  0x19   :  { %320 = vmatpush.bf16.msra.mxu2 %v608_v8  ;;  %v660_v17 = vor.u32 %v768_v15, %v659_v14  ;;  %v767_v20 = vld [vmem:[#allocation5 + $0xe4] sm:$0xf]  ;;  %v600_v21 = vor.u32 %v751_v18, %v597_v19  ;;  %v661_v22 = vld [vmem:[#allocation5 + $0xe8] sm:$0xf0]  ;;  %v587_v23 = vld [vmem:[#allocation5 + $0x50] sm:$0xf] }
  0x1a   :  { %334 = vmatpush.bf16.msra.mxu3 %v672_v12  ;;  %v750_v24 = vld [vmem:[#allocation5 + $0x54] sm:$0xf0]  ;;  %v664_v25 = vor.u32 %v767_v20, %v661_v22  ;;  %v651_v26 = vld [vmem:[#allocation5 + $0xd0] sm:$0xf]  ;;  %v749_v28 = vld [vmem:[#allocation5 + $0x54] sm:$0xf] }
  0x1b   :  { %v766_v27 = vld [vmem:[#allocation5 + $0xd4] sm:$0xf0]  ;;  %293 = vmatpush.bf16.msra.mxu0 %v596_v16  ;;  %v588_v29 = vor.u32 %v750_v24, %v587_v23  ;;  %v589_v30 = vld [vmem:[#allocation5 + $0x58] sm:$0xf0]  ;;  %v765_v31 = vld [vmem:[#allocation5 + $0xd4] sm:$0xf] }
  0x1c   :  { %v653_v32 = vld [vmem:[#allocation5 + $0xd8] sm:$0xf0]  ;;  %307 = vmatpush.bf16.msra.mxu1 %v660_v17  ;;  %v652_v33 = vor.u32 %v766_v27, %v651_v26  ;;  %v592_v34 = vor.u32 %v749_v28, %v589_v30  ;;  %v579_v35 = vld [vmem:[#allocation5 + $0x40] sm:$0xf]  ;;  %v748_v36 = vld [vmem:[#allocation5 + $0x44] sm:$0xf0] }
  0x1d   :  { %321 = vmatpush.bf16.msra.mxu2 %v600_v21  ;;  %v643_v37 = vld [vmem:[#allocation5 + $0xc0] sm:$0xf]  ;;  %v656_v38 = vor.u32 %v765_v31, %v653_v32  ;;  %v764_v39 = vld [vmem:[#allocation5 + $0xc4] sm:$0xf0]  ;;  %v747_v40 = vld [vmem:[#allocation5 + $0x44] sm:$0xf]  ;;  %v580_v44 = vor.u32 %v748_v36, %v579_v35 }
  0x1e   :  { %335 = vmatpush.bf16.msra.mxu3 %v664_v25  ;;  %v581_v41 = vld [vmem:[#allocation5 + $0x48] sm:$0xf0]  ;;  %v763_v42 = vld [vmem:[#allocation5 + $0xc4] sm:$0xf]  ;;  %v644_v45 = vor.u32 %v764_v39, %v643_v37  ;;  %v571_v47 = vld [vmem:[#allocation5 + $0x30] sm:$0xf] }
  0x1f   :  { %v645_v43 = vld [vmem:[#allocation5 + $0xc8] sm:$0xf0]  ;;  %294 = vmatpush.bf16.msra.mxu0 %v588_v29  ;;  %v584_v46 = vor.u32 %v747_v40, %v581_v41  ;;  %v746_v48 = vld [vmem:[#allocation5 + $0x34] sm:$0xf0]  ;;  %v635_v49 = vld [vmem:[#allocation5 + $0xb0] sm:$0xf] }
  0x20   :  { %308 = vmatpush.bf16.msra.mxu1 %v652_v33  ;;  %v648_v50 = vor.u32 %v763_v42, %v645_v43  ;;  %v762_v51 = vld [vmem:[#allocation5 + $0xb4] sm:$0xf0]  ;;  %v745_v52 = vld [vmem:[#allocation5 + $0x34] sm:$0xf]  ;;  %v573_v53 = vld [vmem:[#allocation5 + $0x38] sm:$0xf0]  ;;  %v572_v56 = vor.u32 %v746_v48, %v571_v47 }
  0x21   :  { %322 = vmatpush.bf16.msra.mxu2 %v592_v34  ;;  %v761_v54 = vld [vmem:[#allocation5 + $0xb4] sm:$0xf]  ;;  %v637_v55 = vld [vmem:[#allocation5 + $0xb8] sm:$0xf0]  ;;  %v636_v57 = vor.u32 %v762_v51, %v635_v49  ;;  %v576_v58 = vor.u32 %v745_v52, %v573_v53  ;;  %v563_v59 = vld [vmem:[#allocation5 + $0x20] sm:$0xf] }
  0x22   :  { %336 = vmatpush.bf16.msra.mxu3 %v656_v38  ;;  %v744_v60 = vld [vmem:[#allocation5 + $0x24] sm:$0xf0]  ;;  %v627_v61 = vld [vmem:[#allocation5 + $0xa0] sm:$0xf]  ;;  %v640_v62 = vor.u32 %v761_v54, %v637_v55  ;;  %v743_v0 = vld [vmem:[#allocation5 + $0x24] sm:$0xf] }
  0x23   :  { %295 = vmatpush.bf16.msra.mxu0 %v580_v44  ;;  %v760_v63 = vld [vmem:[#allocation5 + $0xa4] sm:$0xf0]  ;;  %v565_v1 = vld [vmem:[#allocation5 + $0x28] sm:$0xf0]  ;;  %v759_v2 = vld [vmem:[#allocation5 + $0xa4] sm:$0xf]  ;;  %v564_v4 = vor.u32 %v744_v60, %v563_v59 }
  0x24   :  { %309 = vmatpush.bf16.msra.mxu1 %v644_v45  ;;  %v629_v3 = vld [vmem:[#allocation5 + $0xa8] sm:$0xf0]  ;;  %v628_v5 = vor.u32 %v760_v63, %v627_v61  ;;  %v568_v6 = vor.u32 %v743_v0, %v565_v1  ;;  %v555_v7 = vld [vmem:[#allocation5 + $0x10] sm:$0xf]  ;;  %v742_v8 = vld [vmem:[#allocation5 + $0x14] sm:$0xf0] }
  0x25   :  { %323 = vmatpush.bf16.msra.mxu2 %v584_v46  ;;  %v619_v9 = vld [vmem:[#allocation5 + $0x90] sm:$0xf]  ;;  %v632_v10 = vor.u32 %v759_v2, %v629_v3  ;;  %v758_v11 = vld [vmem:[#allocation5 + $0x94] sm:$0xf0]  ;;  %v741_v12 = vld [vmem:[#allocation5 + $0x14] sm:$0xf]  ;;  %v556_v16 = vor.u32 %v742_v8, %v555_v7 }
  0x26   :  { %337 = vmatpush.bf16.msra.mxu3 %v648_v50  ;;  %v557_v13 = vld [vmem:[#allocation5 + $0x18] sm:$0xf0]  ;;  %v757_v14 = vld [vmem:[#allocation5 + $0x94] sm:$0xf]  ;;  %v547_v17 = vld [vmem:[#allocation5] sm:$0xf]  ;;  %v620_v18 = vor.u32 %v758_v11, %v619_v9 }
  0x27   :  { %296 = vmatpush.bf16.msra.mxu0 %v572_v56  ;;  %v621_v15 = vld [vmem:[#allocation5 + $0x98] sm:$0xf0]  ;;  %v560_v19 = vor.u32 %v741_v12, %v557_v13  ;;  %v740_v20 = vld [vmem:[#allocation5 + $0x4] sm:$0xf0]  ;;  %v611_v21 = vld [vmem:[#allocation5 + $0x80] sm:$0xf] }
  0x28   :  { %310 = vmatpush.bf16.msra.mxu1 %v636_v57  ;;  %v756_v22 = vld [vmem:[#allocation5 + $0x84] sm:$0xf0]  ;;  %v624_v23 = vor.u32 %v757_v14, %v621_v15  ;;  %v739_v24 = vld [vmem:[#allocation5 + $0x4] sm:$0xf]  ;;  %v549_v25 = vld [vmem:[#allocation5 + $0x8] sm:$0xf0]  ;;  %v548_v28 = vor.u32 %v740_v20, %v547_v17 }
  0x29   :  { %324 = vmatpush.bf16.msra.mxu2 %v576_v58  ;;  %v755_v26 = vld [vmem:[#allocation5 + $0x84] sm:$0xf]  ;;  %v613_v27 = vld [vmem:[#allocation5 + $0x88] sm:$0xf0]  ;;  %v539_v29 = vld [vmem:[#allocation2] sm:$0xf]  ;;  %v612_v31 = vor.u32 %v756_v22, %v611_v21  ;;  %v552_v32 = vor.u32 %v739_v24, %v549_v25 }
  0x2a   :  { %338 = vmatpush.bf16.msra.mxu3 %v640_v62  ;;  %v738_v30 = vld [vmem:[#allocation2 + $0x4] sm:$0xf0]  ;;  %v737_v33 = vld [vmem:[#allocation2 + $0x4] sm:$0xf]  ;;  %v541_v34 = vld [vmem:[#allocation2 + $0x8] sm:$0xf0]  ;;  %v616_v35 = vor.u32 %v755_v26, %v613_v27 }
  0x2b   :  { %297 = vmatpush.bf16.msra.mxu0 %v564_v4  ;;  %v778_v36 = vld [vmem:[#allocation8 + $0x38] sm:$0xff]  ;;  %v540_v37 = vor.u32 %v738_v30, %v539_v29  ;;  %v544_v39 = vor.u32 %v737_v33, %v541_v34  ;;  %v777_v40 = vld [vmem:[#allocation8 + $0x30] sm:$0xff]  ;;  %v776_v42 = vld [vmem:[#allocation8 + $0x28] sm:$0xff]  ;;  %s933_s15 = smov [#allocation10]   ;;  %s522_s19 = sshll.u32 %s996_s5, 4  ;;  %s523_s19 = int_to_ptr.hbm [resolvable:$true] %s522_s19 }
  0x2c   :  { %311 = vmatpush.bf16.msra.mxu1 %v628_v5  ;;  %v786_v38 = vld [vmem:[#allocation8 + $0x78] sm:$0xff]  ;;  %v785_v41 = vld [vmem:[#allocation8 + $0x70] sm:$0xff]  ;;  %v775_v43 = vld [vmem:[#allocation8 + $0x20] sm:$0xff]  ;;  %s520_s16 = sshll.u32 %s933_s15, 4  ;;  %s521_s16 = int_to_ptr.vmem [resolvable:$true] %s520_s16 }
  0x2d   :  { %325 = vmatpush.bf16.msra.mxu2 %v568_v6  ;;  %v784_v44 = vld [vmem:[#allocation8 + $0x68] sm:$0xff]  ;;  %v774_v45 = vld [vmem:[#allocation8 + $0x18] sm:$0xff]  ;;  %v783_v46 = vld [vmem:[#allocation8 + $0x60] sm:$0xff] }
  0x2e   :  { %339 = vmatpush.bf16.msra.mxu3 %v632_v10  ;;  %v773_v47 = vld [vmem:[#allocation8 + $0x10] sm:$0xff]  ;;  %v782_v48 = vld [vmem:[#allocation8 + $0x58] sm:$0xff]  ;;  %v772_v49 = vld [vmem:[#allocation8 + $0x8] sm:$0xff] }
  0x2f   :  { %298 = vmatpush.bf16.msra.mxu0 %v556_v16  ;;  %v781_v50 = vld [vmem:[#allocation8 + $0x50] sm:$0xff]  ;;  %v771_v51 = vld [vmem:[#allocation8] sm:$0xff]  ;;  %v780_v52 = vld [vmem:[#allocation8 + $0x48] sm:$0xff] }
  0x30   :  { %312 = vmatpush.bf16.msra.mxu1 %v620_v18  ;;  %v779_v53 = vld [vmem:[#allocation8 + $0x40] sm:$0xff]  ;;  %v116_v54 = vld [vmem:[#allocation7] sm:$0x3]  ;;  %v796_v16 = vld [vmem:[%s995_s4] ss:$0 sm:$0xff] }
  0x31   :  { %326 = vmatpush.bf16.msra.mxu2 %v560_v19  ;;  %v118_v56 = vperm.slane %v116_v54, 0  ;;  %v119_v60 = vperm.slane %v116_v54, 1 }
  0x32   :  { %340 = vmatpush.bf16.msra.mxu3 %v624_v23 }
  0x33   :  { %299 = vmatpush.bf16.msra.mxu0 %v548_v28 }
  0x34   :  { %313 = vmatpush.bf16.msra.mxu1 %v612_v31 }
  0x35   :  { %327 = vmatpush.bf16.msra.mxu2 %v552_v32 }
  0x36   :  { %341 = vmatpush.bf16.msra.mxu3 %v616_v35  ;;  %300 = vmatmul.bf16.vlgmr.msra.gmra.mxu0 %v540_v37 }
  0x37   :  { %486 = vmatpush.bf16.msrb.mxu0 %v778_v36  ;;  %314 = vmatmul.bf16.vlgmr.msra.gmra.mxu1 %v544_v39 }
  0x38   :  { %500 = vmatpush.bf16.msrb.mxu1 %v786_v38  ;;  %328 = vmatmul.bf16.vlgmr.msra.gmra.mxu2 %v540_v37 }
  0x39   :  { %342 = vmatmul.bf16.vlgmr.msra.gmra.mxu3 %v544_v39 }
  0x3b   :  { %487 = vmatpush.bf16.msrb.mxu0 %v777_v40 }
  0x3c   :  { %501 = vmatpush.bf16.msrb.mxu1 %v785_v41 }
  0x3f   :  { %488 = vmatpush.bf16.msrb.mxu0 %v776_v42 }
  0x40   :  { %502 = vmatpush.bf16.msrb.mxu1 %v784_v44 }
  0x43   :  { %489 = vmatpush.bf16.msrb.mxu0 %v775_v43 }
  0x44   :  { %503 = vmatpush.bf16.msrb.mxu1 %v783_v46 }
  0x47   :  { %490 = vmatpush.bf16.msrb.mxu0 %v774_v45 }
  0x48   :  { %504 = vmatpush.bf16.msrb.mxu1 %v782_v48 }
  0x4b   :  { %491 = vmatpush.bf16.msrb.mxu0 %v773_v47 }
  0x4c   :  { %505 = vmatpush.bf16.msrb.mxu1 %v781_v50 }
  0x4f   :  { %492 = vmatpush.bf16.msrb.mxu0 %v772_v49 }
  0x50   :  { %506 = vmatpush.bf16.msrb.mxu1 %v780_v52 }
  0x53   :  { %493 = vmatpush.bf16.msrb.mxu0 %v771_v51 }
  0x54   :  { %507 = vmatpush.bf16.msrb.mxu1 %v779_v53 }
  0xb3   :  { %v301_v55 = vpop.f32.mrf.mxu0 }
  0xb4   :  { %v315_v57 = vpop.f32.mrf.mxu1  ;;  %v302_v58 = vadd.f32 %v301_v55, %v118_v56 }
  0xb6   :  { %v316_v63 = vadd.f32 %v315_v57, %v302_v58 }
  0xb8   :  { %v348_v4 = vmax.f32 %v316_v63, 0.0 }
  0xbb   :  { %v329_v59 = vpop.f32.mrf.mxu2  ;;  %v303_v62 = vpop.f32.mrf.mxu0 }
  0xbc   :  { %v343_v61 = vpop.f32.mrf.mxu3  ;;  %v304_v0 = vadd.f32 %v303_v62, %v118_v56  ;;  %v317_v1 = vpop.f32.mrf.mxu1  ;;  %v330_v3 = vadd.f32 %v329_v59, %v119_v60 }
  0xbe   :  { %v318_v2 = vadd.f32 %v317_v1, %v304_v0  ;;  %v344_v8 = vadd.f32 %v343_v61, %v330_v3 }
  0xc0   :  { %v350_v5 = vmax.f32 %v318_v2, 0.0  ;;  %v349_v12 = vmax.f32 %v344_v8, 0.0 }
  0xc2   :  { %v352_v6 = vpack.c.bf16 %v350_v5, %v348_v4 }
  0xc3   :  { %v331_v7 = vpop.f32.mrf.mxu2 }
  0xc4   :  { %v332_v9 = vadd.f32 %v331_v7, %v119_v60  ;;  %v345_v10 = vpop.f32.mrf.mxu3  ;;  %494 = vmatmul.bf16.vlgmr.msrb.gmra.mxu0 %v352_v6 }
  0xc6   :  { %v346_v11 = vadd.f32 %v345_v10, %v332_v9 }
  0xc8   :  { %v351_v13 = vmax.f32 %v346_v11, 0.0 }
  0xca   :  { %v353_v14 = vpack.c.bf16 %v351_v13, %v349_v12 }
  0xcc   :  { %508 = vmatmul.bf16.vlgmr.msrb.gmra.mxu1 %v353_v14 }
 0x141   :  { %v495_v15 = vpop.f32.mrf.mxu0 }
 0x142   :  { %v496_v17 = vadd.f32 %v796_v16, %v495_v15 }
 0x149   :  { %v509_v18 = vpop.f32.mrf.mxu1  ;;  %v497_v20 = vpop.f32.mrf.mxu0 }
 0x14a   :  { %v510_v19 = vadd.f32 %v509_v18, %v496_v17  ;;  %v498_v21 = vadd.f32 %v796_v16, %v497_v20 }
 0x14c   :  { %514 = vst [vmem:[#allocation10] sm:$0xff] %v510_v19 }
 0x151   :  { %v511_v22 = vpop.f32.mrf.mxu1 }
 0x152   :  { %v512_v23 = vadd.f32 %v511_v22, %v498_v21 }
 0x154   :  { %515 = vst [vmem:[#allocation10 + $0x8] sm:$0xff] %v512_v23 }
 0x155   :  { %528 = dma.vmem_to_hbm [thread:$0]  %s521_s16, 256, %s523_s19, [#allocation4], %s926_s26, %s926_s26, %s927_s27  }
 0x156   :  { %923 = dma.done.wait [#allocation4], 256  }
 0x157   :  { %924 = vsyncadd [#allocation4], 4294967040 }
 0x158   :  { %533 = vsyncpa [#allocation3], 1 }
 0x159   :  { %534 = vsyncpa [#allocation6], 1 }
 0x15a   :  { %535 = vsyncpa [#allocation9], 1 }
 0x15b   :  { %536 = vsyncpa [#allocation4], 1 }

</bundles_post_ra>
